<compile_context>
chip_gen: v6e
topology: v6e:2x2x1
jax: 0.10.0
libtpu: 0.0.40
codegen_flags: <defaults>
</compile_context>

<pallas_src>
import jax
import jax.numpy as jnp
from jax import lax
from jax.experimental import pallas as pl
from jax.experimental.pallas import tpu as pltpu

HIDDEN = 256                    # conv1 out channels (fixed by the module)
BN_EPS = 1e-5                   # nn.BatchNorm2d default eps
# Not binding for these tile sizes; raise toward 64-96 MiB on 128 MiB parts (v5e/v6e)
# when scaling H, W up; keep <= ~48 MiB on v7x (64 MiB physical).
VMEM_LIMIT = 32 * 1024 * 1024


# ----------------------------------------------------------------------------
# Kernel 1: fused 3x3 conv (single K = 9*Cin matmul on an im2col row tile)
#           + per-tile BN partial statistics.
# ----------------------------------------------------------------------------
def conv3x3_stats_kernel(p_ref, w1_ref, b1_ref, h_ref, sum_ref, ssq_ref):
    # (tm, 9*Cin) @ (9*Cin, 256) -> (tm, 256), f32 accumulation on the MXU.
    h = jnp.dot(p_ref[...], w1_ref[...], preferred_element_type=jnp.float32)
    h = h + b1_ref[...]
    h_ref[...] = h.astype(h_ref.dtype)                         # bf16 intermediate
    # Per-tile partial statistics; each grid step writes its own (i, ...) block,
    # so the grid axis is safely "parallel".
    sum_ref[0] = jnp.sum(h, axis=0, keepdims=True)
    ssq_ref[0] = jnp.sum(h * h, axis=0, keepdims=True)


# ----------------------------------------------------------------------------
# Kernel 2: fused BN-affine (scale/shift) + ReLU + 1x1 conv, lane-dense bf16 out.
# ----------------------------------------------------------------------------
def bn_relu_conv1x1_kernel(h_ref, scale_ref, shift_ref, w2_ref, b2_ref, o_ref):
    h = h_ref[...].astype(jnp.float32)
    hr = jnp.maximum(h * scale_ref[...] + shift_ref[...], 0.0)
    out = jnp.dot(hr.astype(jnp.bfloat16), w2_ref[...],
                  preferred_element_type=jnp.float32) + b2_ref[...]
    o_ref[...] = out.astype(o_ref.dtype)


def _choose_row_tile(m, cap=512, min_steps=4):
    """Multiple-of-8 row tile giving >= min_steps grid steps when m allows, capped."""
    tm = -(-m // min_steps)            # cdiv
    tm = ((tm + 7) // 8) * 8           # round up to sublane multiple
    return max(8, min(tm, cap))


@jax.jit
def vit_segmentation_head(x_nhwc, params):
    """Forward pass. x_nhwc: [N, H, W, Cin] float32 -> [N, H, W, num_classes] float32."""
    N, H, W, Cin = x_nhwc.shape
    w1, b1, gamma, beta, w2, b2 = (params["w1"], params["b1"], params["gamma"],
                                   params["beta"], params["w2"], params["b2"])
    num_classes = w2.shape[1]
    Kc = 9 * Cin
    M = N * H * W
    ncp = ((num_classes + 127) // 128) * 128          # lane-dense padded class dim

    tm = _choose_row_tile(M)
    m_pad = -(-M // tm) * tm
    grid_m = m_pad // tm
    pad_rows = m_pad - M

    # --- im2col patch matrix [m_pad, 9*Cin], lane-packed (fine for ViT-head sized maps).
    # TODO(synk): for very large H*W switch to an in-kernel halo-band fetch to avoid
    # materializing the 9x patch matrix in HBM.
    x_pad = jnp.pad(x_nhwc, ((0, 0), (1, 1), (1, 1), (0, 0)))
    patches = jnp.concatenate(
        [x_pad[:, kh:kh + H, kw:kw + W, :] for kh in range(3) for kw in range(3)],
        axis=-1).reshape(M, Kc)
    patches = jnp.pad(patches, ((0, pad_rows), (0, 0))).astype(jnp.bfloat16)

    # Weights: (kh, kw, Cin)-major flattening matches the patch concat order above.
    w1_mat = w1.reshape(Kc, HIDDEN).astype(jnp.bfloat16)
    b1_row = b1.reshape(1, HIDDEN).astype(jnp.float32)
    w2_pad = jnp.zeros((HIDDEN, ncp), jnp.bfloat16).at[:, :num_classes].set(
        w2.astype(jnp.bfloat16))
    b2_pad = jnp.zeros((1, ncp), jnp.float32).at[:, :num_classes].set(b2)

    # --- kernel 1: fused conv3x3 + per-tile BN partial stats (grid over M tiles) ---
    h1, psum, pssq = pl.pallas_call(
        conv3x3_stats_kernel,
        out_shape=(jax.ShapeDtypeStruct((m_pad, HIDDEN), jnp.bfloat16),
                   jax.ShapeDtypeStruct((grid_m, 1, HIDDEN), jnp.float32),
                   jax.ShapeDtypeStruct((grid_m, 1, HIDDEN), jnp.float32)),
        grid_spec=pltpu.PrefetchScalarGridSpec(
            num_scalar_prefetch=0,
            grid=(grid_m,),
            in_specs=[pl.BlockSpec((tm, Kc), lambda i: (i, 0)),
                      pl.BlockSpec((Kc, HIDDEN), lambda i: (0, 0)),
                      pl.BlockSpec((1, HIDDEN), lambda i: (0, 0))],
            out_specs=(pl.BlockSpec((tm, HIDDEN), lambda i: (i, 0)),
                       pl.BlockSpec((1, 1, HIDDEN), lambda i: (i, 0, 0)),
                       pl.BlockSpec((1, 1, HIDDEN), lambda i: (i, 0, 0)))),
        compiler_params=pltpu.CompilerParams(
            dimension_semantics=("parallel",),
            vmem_limit_bytes=VMEM_LIMIT),
    )(patches, w1_mat, b1_row)

    # --- glue: finalize batch stats; fold BN into one per-channel affine ---
    total = jnp.sum(psum, axis=0)                                # (1, 256)
    totsq = jnp.sum(pssq, axis=0)
    # Zero-padded patch rows produce exactly b1 per channel; remove them analytically.
    total = total - float(pad_rows) * b1_row
    totsq = totsq - float(pad_rows) * (b1_row * b1_row)
    mean = total / float(M)
    var = jnp.maximum(totsq / float(M) - mean * mean, 0.0)
    invstd = lax.rsqrt(var + BN_EPS)
    scale = (gamma.reshape(1, HIDDEN) * invstd).astype(jnp.float32)
    shift = (beta.reshape(1, HIDDEN) - mean * scale).astype(jnp.float32)

    # --- kernel 2: BN-affine + ReLU + 1x1 conv over the same M tiles (bf16 lane-dense) ---
    out_pad = pl.pallas_call(
        bn_relu_conv1x1_kernel,
        out_shape=jax.ShapeDtypeStruct((m_pad, ncp), jnp.bfloat16),
        grid_spec=pltpu.PrefetchScalarGridSpec(
            num_scalar_prefetch=0,
            grid=(grid_m,),
            in_specs=[pl.BlockSpec((tm, HIDDEN), lambda i: (i, 0)),
                      pl.BlockSpec((1, HIDDEN), lambda i: (0, 0)),
                      pl.BlockSpec((1, HIDDEN), lambda i: (0, 0)),
                      pl.BlockSpec((HIDDEN, ncp), lambda i: (0, 0)),
                      pl.BlockSpec((1, ncp), lambda i: (0, 0))],
            out_specs=pl.BlockSpec((tm, ncp), lambda i: (i, 0))),
        compiler_params=pltpu.CompilerParams(
            dimension_semantics=("parallel",),
            vmem_limit_bytes=VMEM_LIMIT),
    )(h1, scale, shift, w2_pad, b2_pad)

    out = out_pad[:M, :num_classes].astype(jnp.float32)
    return out.reshape(N, H, W, num_classes)


def init_params(key, in_channels, num_classes):
    """Deterministic synthetic parameters matching the PyTorch module's shapes."""
    k1, k2, k3, k4, k5, k6 = jax.random.split(key, 6)
    # torch conv1.weight is [256, Cin, 3, 3]; stored pre-transposed as [3, 3, Cin, 256].
    w1 = jax.random.normal(k1, (3, 3, in_channels, HIDDEN), jnp.float32) * 0.05
    b1 = jax.random.normal(k2, (HIDDEN,), jnp.float32) * 0.05
    gamma = 1.0 + 0.1 * jax.random.normal(k3, (HIDDEN,), jnp.float32)
    beta = 0.1 * jax.random.normal(k4, (HIDDEN,), jnp.float32)
    # torch conv2.weight is [num_classes, 256, 1, 1]; stored as [256, num_classes].
    w2 = jax.random.normal(k5, (HIDDEN, num_classes), jnp.float32) * 0.05
    b2 = jax.random.normal(k6, (num_classes,), jnp.float32) * 0.05
    return dict(w1=w1, b1=b1, gamma=gamma, beta=beta, w2=w2, b2=b2)


def reference_forward(x_nhwc, params):
    """Pure-JAX f32 reference matching the PyTorch module in train mode."""
    h = lax.conv_general_dilated(
        x_nhwc, params["w1"], window_strides=(1, 1), padding="SAME",
        dimension_numbers=("NHWC", "HWIO", "NHWC")) + params["b1"]
    mean = jnp.mean(h, axis=(0, 1, 2))
    var = jnp.var(h, axis=(0, 1, 2))        # biased variance, as BN train-mode normalization
    hn = (h - mean) * lax.rsqrt(var + BN_EPS) * params["gamma"] + params["beta"]
    hr = jnp.maximum(hn, 0.0)
    return jnp.einsum("nhwc,ck->nhwk", hr, params["w2"]) + params["b2"]


if __name__ == "__main__":
    key = jax.random.PRNGKey(0)
    kx, kp = jax.random.split(key)

    N, Cin, Hs, Ws = 2, 4, 16, 16
    num_classes = 5

    # PyTorch input would be NCHW [2, 4, 16, 16]; convert to NHWC for the TPU kernels.
    x_nchw = jax.random.normal(kx, (N, Cin, Hs, Ws), jnp.float32)
    x_nhwc = jnp.transpose(x_nchw, (0, 2, 3, 1))

    params = init_params(kp, Cin, num_classes)

    out_nhwc = jax.block_until_ready(vit_segmentation_head(x_nhwc, params))
    out_nchw = jnp.transpose(out_nhwc, (0, 3, 1, 2))   # matches PyTorch output layout

    ref = reference_forward(x_nhwc, params)
    err = float(jnp.max(jnp.abs(out_nhwc - ref)))      # bf16 MXU path -> loose tolerance

    assert out_nchw.shape == (N, num_classes, Hs, Ws)
    assert bool(jnp.all(jnp.isfinite(out_nchw)))
    assert err < 0.15, f"max abs error vs f32 reference too large: {err}"
    print("KERNEL_OK")
</pallas_src>

<mosaic_0001>
module attributes {stable_mosaic.version = 11 : i64} {
  func.func @conv3x3_stats_kernel(%arg0: i32, %arg1: memref<128x36xbf16, #tpu.memory_space<vmem>>, %arg2: memref<36x256xbf16, #tpu.memory_space<vmem>>, %arg3: memref<1x256xf32, #tpu.memory_space<vmem>>, %arg4: memref<128x256xbf16, #tpu.memory_space<vmem>>, %arg5: memref<1x1x256xf32, #tpu.memory_space<vmem>>, %arg6: memref<1x1x256xf32, #tpu.memory_space<vmem>>) attributes {dimension_semantics = [#tpu.dimension_semantics<parallel>], iteration_bounds = array<i64: 4>, scalar_prefetch = 0 : i64, scratch_operands = 0 : i64, tpu.core_type = #tpu.core_type<tc>, window_params = [{transform_indices = @transform_0, window_bounds = array<i64: 128, 36>}, {pipeline_mode = #tpu.pipeline_mode<synchronous>, transform_indices = @transform_1, window_bounds = array<i64: 36, 256>}, {pipeline_mode = #tpu.pipeline_mode<synchronous>, transform_indices = @transform_2, window_bounds = array<i64: 1, 256>}, {transform_indices = @transform_3, window_bounds = array<i64: 128, 256>}, {transform_indices = @transform_4, window_bounds = array<i64: 1, 1, 256>}, {transform_indices = @transform_5, window_bounds = array<i64: 1, 1, 256>}]} {
    %c0 = arith.constant 0 : index
    %c0_0 = arith.constant 0 : index
    %0 = vector.load %arg1[%c0, %c0_0] : memref<128x36xbf16, #tpu.memory_space<vmem>>, vector<128x36xbf16>
    %c0_1 = arith.constant 0 : index
    %c0_2 = arith.constant 0 : index
    %1 = vector.load %arg2[%c0_1, %c0_2] : memref<36x256xbf16, #tpu.memory_space<vmem>>, vector<36x256xbf16>
    %cst = arith.constant dense<0.000000e+00> : vector<128x256xf32>
    %2 = tpu.matmul %0, %1, %cst {dimension_numbers = #tpu.dot_dimension_numbers<[1], [0], [0], [1], [0, 0, 1, 1], [], []>} : vector<128x36xbf16>, vector<36x256xbf16>, vector<128x256xf32> -> vector<128x256xf32>
    %c0_3 = arith.constant 0 : index
    %c0_4 = arith.constant 0 : index
    %3 = vector.load %arg3[%c0_3, %c0_4] : memref<1x256xf32, #tpu.memory_space<vmem>>, vector<1x256xf32>
    %4 = vector.broadcast %3 : vector<1x256xf32> to vector<128x256xf32>
    %5 = arith.addf %2, %4 : vector<128x256xf32>
    %6 = arith.truncf %5 : vector<128x256xf32> to vector<128x256xbf16>
    %c0_5 = arith.constant 0 : index
    %c0_6 = arith.constant 0 : index
    %7 = vector.load %arg4[%c0_5, %c0_6] : memref<128x256xbf16, #tpu.memory_space<vmem>>, vector<128x256xbf16>
    tpu.vector_store %arg4[%c0_5, %c0_6], %6 {strides = array<i32>} : memref<128x256xbf16, #tpu.memory_space<vmem>>, vector<128x256xbf16>,
    %cst_7 = arith.constant dense<0.000000e+00> : vector<256xf32>
    %8 = vector.multi_reduction <add>, %5, %cst_7 [0] : vector<128x256xf32> to vector<256xf32>
    %9 = vector.shape_cast %8 : vector<256xf32> to vector<1x256xf32>
    %c0_8 = arith.constant 0 : index
    %c0_9 = arith.constant 0 : index
    %c0_10 = arith.constant 0 : index
    %10 = vector.load %arg5[%c0_8, %c0_9, %c0_10] : memref<1x1x256xf32, #tpu.memory_space<vmem>>, vector<1x1x256xf32>
    %11 = vector.shape_cast %10 : vector<1x1x256xf32> to vector<1x256xf32>
    %12 = vector.shape_cast %9 : vector<1x256xf32> to vector<1x1x256xf32>
    tpu.vector_store %arg5[%c0_8, %c0_9, %c0_10], %12 {strides = array<i32>} : memref<1x1x256xf32, #tpu.memory_space<vmem>>, vector<1x1x256xf32>,
    %13 = arith.mulf %5, %5 : vector<128x256xf32>
    %cst_11 = arith.constant dense<0.000000e+00> : vector<256xf32>
    %14 = vector.multi_reduction <add>, %13, %cst_11 [0] : vector<128x256xf32> to vector<256xf32>
    %15 = vector.shape_cast %14 : vector<256xf32> to vector<1x256xf32>
    %c0_12 = arith.constant 0 : index
    %c0_13 = arith.constant 0 : index
    %c0_14 = arith.constant 0 : index
    %16 = vector.load %arg6[%c0_12, %c0_13, %c0_14] : memref<1x1x256xf32, #tpu.memory_space<vmem>>, vector<1x1x256xf32>
    %17 = vector.shape_cast %16 : vector<1x1x256xf32> to vector<1x256xf32>
    %18 = vector.shape_cast %15 : vector<1x256xf32> to vector<1x1x256xf32>
    tpu.vector_store %arg6[%c0_12, %c0_13, %c0_14], %18 {strides = array<i32>} : memref<1x1x256xf32, #tpu.memory_space<vmem>>, vector<1x1x256xf32>,
    return
  }
  func.func @transform_0(%arg0: i32) -> (i32, i32) {
    %c0_i32 = arith.constant 0 : i32
    %c0_i32_0 = arith.constant 0 : i32
    return %arg0, %c0_i32 : i32, i32
  }
  func.func @transform_1(%arg0: i32) -> (i32, i32) {
    %c0_i32 = arith.constant 0 : i32
    %c0_i32_0 = arith.constant 0 : i32
    %c0_i32_1 = arith.constant 0 : i32
    return %c0_i32, %c0_i32_0 : i32, i32
  }
  func.func @transform_2(%arg0: i32) -> (i32, i32) {
    %c0_i32 = arith.constant 0 : i32
    %c0_i32_0 = arith.constant 0 : i32
    %c0_i32_1 = arith.constant 0 : i32
    return %c0_i32, %c0_i32_0 : i32, i32
  }
  func.func @transform_3(%arg0: i32) -> (i32, i32) {
    %c0_i32 = arith.constant 0 : i32
    %c0_i32_0 = arith.constant 0 : i32
    return %arg0, %c0_i32 : i32, i32
  }
  func.func @transform_4(%arg0: i32) -> (i32, i32, i32) {
    %c0_i32 = arith.constant 0 : i32
    %c0_i32_0 = arith.constant 0 : i32
    %c0_i32_1 = arith.constant 0 : i32
    return %arg0, %c0_i32, %c0_i32_0 : i32, i32, i32
  }
  func.func @transform_5(%arg0: i32) -> (i32, i32, i32) {
    %c0_i32 = arith.constant 0 : i32
    %c0_i32_0 = arith.constant 0 : i32
    %c0_i32_1 = arith.constant 0 : i32
    return %arg0, %c0_i32, %c0_i32_0 : i32, i32, i32
  }
}

module attributes {stable_mosaic.version = 11 : i64} {
  func.func @bn_relu_conv1x1_kernel(%arg0: i32, %arg1: memref<128x256xbf16, #tpu.memory_space<vmem>>, %arg2: memref<1x256xf32, #tpu.memory_space<vmem>>, %arg3: memref<1x256xf32, #tpu.memory_space<vmem>>, %arg4: memref<256x128xbf16, #tpu.memory_space<vmem>>, %arg5: memref<1x128xf32, #tpu.memory_space<vmem>>, %arg6: memref<128x128xbf16, #tpu.memory_space<vmem>>) attributes {dimension_semantics = [#tpu.dimension_semantics<parallel>], iteration_bounds = array<i64: 4>, scalar_prefetch = 0 : i64, scratch_operands = 0 : i64, tpu.core_type = #tpu.core_type<tc>, window_params = [{transform_indices = @transform_0, window_bounds = array<i64: 128, 256>}, {pipeline_mode = #tpu.pipeline_mode<synchronous>, transform_indices = @transform_1, window_bounds = array<i64: 1, 256>}, {pipeline_mode = #tpu.pipeline_mode<synchronous>, transform_indices = @transform_2, window_bounds = array<i64: 1, 256>}, {pipeline_mode = #tpu.pipeline_mode<synchronous>, transform_indices = @transform_3, window_bounds = array<i64: 256, 128>}, {pipeline_mode = #tpu.pipeline_mode<synchronous>, transform_indices = @transform_4, window_bounds = array<i64: 1, 128>}, {transform_indices = @transform_5, window_bounds = array<i64: 128, 128>}]} {
    %c0 = arith.constant 0 : index
    %c0_0 = arith.constant 0 : index
    %0 = vector.load %arg1[%c0, %c0_0] : memref<128x256xbf16, #tpu.memory_space<vmem>>, vector<128x256xbf16>
    %1 = arith.extf %0 : vector<128x256xbf16> to vector<128x256xf32>
    %c0_1 = arith.constant 0 : index
    %c0_2 = arith.constant 0 : index
    %2 = vector.load %arg2[%c0_1, %c0_2] : memref<1x256xf32, #tpu.memory_space<vmem>>, vector<1x256xf32>
    %3 = vector.broadcast %2 : vector<1x256xf32> to vector<128x256xf32>
    %4 = arith.mulf %1, %3 : vector<128x256xf32>
    %c0_3 = arith.constant 0 : index
    %c0_4 = arith.constant 0 : index
    %5 = vector.load %arg3[%c0_3, %c0_4] : memref<1x256xf32, #tpu.memory_space<vmem>>, vector<1x256xf32>
    %6 = vector.broadcast %5 : vector<1x256xf32> to vector<128x256xf32>
    %7 = arith.addf %4, %6 : vector<128x256xf32>
    %cst = arith.constant 0.000000e+00 : f32
    %8 = vector.broadcast %cst : f32 to vector<128x256xf32>
    %9 = arith.maximumf %7, %8 : vector<128x256xf32>
    %10 = arith.truncf %9 : vector<128x256xf32> to vector<128x256xbf16>
    %c0_5 = arith.constant 0 : index
    %c0_6 = arith.constant 0 : index
    %11 = vector.load %arg4[%c0_5, %c0_6] : memref<256x128xbf16, #tpu.memory_space<vmem>>, vector<256x128xbf16>
    %cst_7 = arith.constant dense<0.000000e+00> : vector<128x128xf32>
    %12 = tpu.matmul %10, %11, %cst_7 {dimension_numbers = #tpu.dot_dimension_numbers<[1], [0], [0], [1], [0, 0, 1, 1], [], []>} : vector<128x256xbf16>, vector<256x128xbf16>, vector<128x128xf32> -> vector<128x128xf32>
    %c0_8 = arith.constant 0 : index
    %c0_9 = arith.constant 0 : index
    %13 = vector.load %arg5[%c0_8, %c0_9] : memref<1x128xf32, #tpu.memory_space<vmem>>, vector<1x128xf32>
    %14 = vector.broadcast %13 : vector<1x128xf32> to vector<128x128xf32>
    %15 = arith.addf %12, %14 : vector<128x128xf32>
    %16 = arith.truncf %15 : vector<128x128xf32> to vector<128x128xbf16>
    %c0_10 = arith.constant 0 : index
    %c0_11 = arith.constant 0 : index
    %17 = vector.load %arg6[%c0_10, %c0_11] : memref<128x128xbf16, #tpu.memory_space<vmem>>, vector<128x128xbf16>
    tpu.vector_store %arg6[%c0_10, %c0_11], %16 {strides = array<i32>} : memref<128x128xbf16, #tpu.memory_space<vmem>>, vector<128x128xbf16>,
    return
  }
  func.func @transform_0(%arg0: i32) -> (i32, i32) {
    %c0_i32 = arith.constant 0 : i32
    %c0_i32_0 = arith.constant 0 : i32
    return %arg0, %c0_i32 : i32, i32
  }
  func.func @transform_1(%arg0: i32) -> (i32, i32) {
    %c0_i32 = arith.constant 0 : i32
    %c0_i32_0 = arith.constant 0 : i32
    %c0_i32_1 = arith.constant 0 : i32
    return %c0_i32, %c0_i32_0 : i32, i32
  }
  func.func @transform_2(%arg0: i32) -> (i32, i32) {
    %c0_i32 = arith.constant 0 : i32
    %c0_i32_0 = arith.constant 0 : i32
    %c0_i32_1 = arith.constant 0 : i32
    return %c0_i32, %c0_i32_0 : i32, i32
  }
  func.func @transform_3(%arg0: i32) -> (i32, i32) {
    %c0_i32 = arith.constant 0 : i32
    %c0_i32_0 = arith.constant 0 : i32
    %c0_i32_1 = arith.constant 0 : i32
    return %c0_i32, %c0_i32_0 : i32, i32
  }
  func.func @transform_4(%arg0: i32) -> (i32, i32) {
    %c0_i32 = arith.constant 0 : i32
    %c0_i32_0 = arith.constant 0 : i32
    %c0_i32_1 = arith.constant 0 : i32
    return %c0_i32, %c0_i32_0 : i32, i32
  }
  func.func @transform_5(%arg0: i32) -> (i32, i32) {
    %c0_i32 = arith.constant 0 : i32
    %c0_i32_0 = arith.constant 0 : i32
    return %arg0, %c0_i32 : i32, i32
  }
}

</mosaic_0001>

<bundles_post_ra>
// kernel: vit_segmentation_head.2
= control target key start
LH: loop header
LB: loop body
LE: loop exit
PB: predicated region body
PF: predicated region fallthrough
CT: control target
= control target key end

     0   :  { %s1027_s18 = smov 0   ;;  %s1230_s0 = inlined_call_operand.vmem [shape: bf16[512,36], index: 0, kind: input, shape index: {}]   ;;  %s1231_s1 = inlined_call_operand.vmem [shape: bf16[36,256], index: 1, kind: input, shape index: {}]   ;;  %s1232_s2 = inlined_call_operand.vmem [shape: f32[1,256], index: 2, kind: input, shape index: {}]   ;;  %s1233_s3 = inlined_call_operand.vmem [shape: bf16[512,256], index: 3, kind: output, shape index: {0}]   ;;  %s1234_s4 = inlined_call_operand.vmem [shape: f32[4,1,256], index: 4, kind: output, shape index: {1}]   ;;  %s1235_s5 = inlined_call_operand.vmem [shape: f32[4,1,256], index: 5, kind: output, shape index: {2}]  }
   0x1 LB: > { %s1033_s19 = sadd.s32 4294967295, %s993_s18   ;;  %p889_p0 = scmp.ge.s32.totalorder %s993_s18, 1  ;;  %s993_s18 = sphi %s1027_s18, %s16_s18  }
   0x2   : > { %p193_p1 = scmp.lt.s32.totalorder %s993_s18, 5 }
   0x4   : > { %p194_p2 = pnand %p889_p0, %p193_p1 }
   0x5   : > { %s890_s24 = sshll.u32 (!%p194_p2), %s1033_s19, 4  ;;  %p243_p4 = scmp.lt.s32.totalorder (!%p194_p2), %s1033_s19, 3 }
   0x6   : > { %197 = sbr.rel (%p194_p2) target bundleno = 291 (0x123), region = 32  ;;  %p231_p3 = scmp.lt.s32.totalorder (!%p194_p2), %s890_s24, 63 }
   0xb   : > { %v272_v0 = vld [vmem:[%s1231_s1 + $0x20] sm:$0x33]  ;;  %vm375_vm0 = vcmask 1041408   ;;  %v973_v3 = vld [vmem:[%s1231_s1 + $0x14] ss:$8 sps:$4 sm:$0xff]   ;;  %v995_v4 = vmov 0   ;;  %v275_v17 = vlaneseq }
   0xc   : > { %v910_v1 = vcombine.high %v272_v0, %v272_v0  ;;  %v909_v2 = vcombine.low %v272_v0, %v272_v0  ;;  %414 = vmatprep.mubr.bf16.mxu0 %v995_v4  ;;  %454 = vmatprep.mubr.bf16.mxu1 %v995_v4  ;;  %v975_v6 = vld [vmem:[%s1231_s1 + $0x10] ss:$8 sps:$4 sm:$0xff]   ;;  %s1237_s24 = smov (!%p231_p3, %s890_s24), 63  ;;  %v976_v7 = vld [vmem:[%s1231_s1 + $0x4] ss:$8 sps:$4 sm:$0xff]   ;;  %vm350_vm1 = vcmask 293888  }
   0xd   : > { %s891_s29 = sshll.u32 %s1237_s24, 2  ;;  %v978_v8 = vld [vmem:[%s1231_s1] ss:$8 sps:$4 sm:$0xff]   ;;  %v1068_v18 = vshrl.u32 %v275_v17, 7  ;;  %s938_s12 = sshll.u32 %s1237_s24, 3  ;;  %vm669_vm2 = vcmp.lt.s32.totalorder %v275_v17, 256 }
   0xe   : > { %911 = vmatprep.subr.msk.bf16.mxu0 %vm375_vm0, %v910_v1  ;;  %v377_v5 = vsel %vm375_vm0, %v909_v2, 0  ;;  %955 = vmatprep.subr.msk.bf16.mxu1 %vm375_vm0, %v910_v1  ;;  %s234_s7 = scalar_lea.vmem %s1230_s0, %s891_s29  ;;  %v273_v21 = vld [vmem:[%s1232_s2] sm:$0x3]  ;;  %s1091_s15 = scalar_lea.vmem %s1233_s3, %s938_s12 }
   0xf   : > { %393 = vmatpush1.bf16.msra.mxu0 %v377_v5  ;;  %958 = vmatpush1.bf16.msra.mxu1 %v377_v5  ;;  %v979_v9 = vld [vmem:[%s234_s7] sm:$0xff]   ;;  %v980_v11 = vld [vmem:[%s234_s7 + $0x8] sm:$0xff]   ;;  %v982_v13 = vld [vmem:[%s234_s7 + $0x10] sm:$0xff]   ;;  %v277_v19 = vsub.s32 0, %v1068_v18  ;;  %v281_v20 = vsub.s32 1, %v1068_v18  ;;  %s1239_s19 = smov (!%p243_p4, %s1033_s19), 3 }
  0x10   : > { %394 = vmatprep.subr.bf16.mxu0 %v973_v3  ;;  %956 = vmatprep.subr.bf16.mxu1 %v973_v3  ;;  %v981_v10 = vld [vmem:[%s234_s7 + $0x20] sm:$0xff]   ;;  %v983_v12 = vld [vmem:[%s234_s7 + $0x28] sm:$0xff]   ;;  %v985_v14 = vld [vmem:[%s234_s7 + $0x30] sm:$0xff]   ;;  %s895_s16 = sshll.u32 %s1239_s19, 1 }
  0x11   : > { %v984_v15 = vld [vmem:[%s234_s7 + $0x18] sm:$0xff]   ;;  %v1075_v22 = vrot.slane %v273_v21, %v277_v19  ;;  %v1077_v23 = vrot.slane %v273_v21, %v281_v20  ;;  %s246_s21 = scalar_lea.vmem %s1234_s4, %s895_s16  ;;  %s250_s24 = scalar_lea.vmem %s1235_s5, %s895_s16 }
  0x12   : > { %v986_v16 = vld [vmem:[%s234_s7 + $0x38] sm:$0xff]  }
  0x13   : > { %395 = vmatpush1.bf16.msra.mxu0 %v975_v6  ;;  %959 = vmatpush1.bf16.msra.mxu1 %v975_v6 }
  0x14   : > { %396 = vmatprep.subr.bf16.mxu0 %v976_v7  ;;  %957 = vmatprep.subr.bf16.mxu1 %v976_v7 }
  0x17   : > { %397 = vmatpush1.bf16.msra.mxu0 %v978_v8  ;;  %960 = vmatpush1.bf16.msra.mxu1 %v978_v8 }
  0x1a   : > { %912 = vmatmul.mubr.msk.bf16.vlgmr.msra.gmra.mxu0 %vm350_vm1, %v979_v9  ;;  %916 = vmatmul.mubr.msk.bf16.vlgmr.msra.gmra.mxu1 %vm350_vm1, %v981_v10 }
  0x1b   : > { %424 = vmatprep.mubr.bf16.mxu0 %v995_v4  ;;  %464 = vmatprep.mubr.bf16.mxu1 %v995_v4 }
  0x22   : > { %913 = vmatmul.mubr.msk.bf16.gmra.mxu0 %vm350_vm1, %v980_v11  ;;  %917 = vmatmul.mubr.msk.bf16.gmra.mxu1 %vm350_vm1, %v983_v12 }
  0x23   : > { %434 = vmatprep.mubr.bf16.mxu0 %v995_v4  ;;  %474 = vmatprep.mubr.bf16.mxu1 %v995_v4 }
  0x2a   : > { %914 = vmatmul.mubr.msk.bf16.gmra.mxu0 %vm350_vm1, %v982_v13  ;;  %918 = vmatmul.mubr.msk.bf16.gmra.mxu1 %vm350_vm1, %v985_v14 }
  0x2b   : > { %444 = vmatprep.mubr.bf16.mxu0 %v995_v4  ;;  %484 = vmatprep.mubr.bf16.mxu1 %v995_v4 }
  0x32   : > { %915 = vmatmul.mubr.msk.bf16.gmra.mxu0 %vm350_vm1, %v984_v15  ;;  %919 = vmatmul.mubr.msk.bf16.gmra.mxu1 %vm350_vm1, %v986_v16 }
  0xda   : > { %v416_v24 = vpop.f32.mrf.mxu0  ;;  %v456_v25 = vpop.f32.mrf.mxu1 }
  0xdb   : > { %v1081_v26 = vadd.f32 %v456_v25, %v1075_v22  ;;  %v417_v29 = vadd.f32 %v416_v24, %v1075_v22 }
  0xdc   : > { %v418_v27 = vpop.f32.mrf.mxu0  ;;  %v458_v28 = vpop.f32.mrf.mxu1 }
  0xdd   : > { %v419_v30 = vadd.f32 %v418_v27, %v1077_v23  ;;  %v1086_v31 = vadd.f32 %v458_v28, %v1077_v23  ;;  %v672_v2 = vmul.f32 %v417_v29, %v417_v29 }
  0xde   : > { %v420_v32 = vpop.f32.mrf.mxu0  ;;  %v460_v33 = vpop.f32.mrf.mxu1 }
  0xdf   : > { %v939_v34 = vpack.c.bf16 %v419_v30, %v417_v29  ;;  %v947_v35 = vpack.c.bf16 %v1086_v31, %v1081_v26  ;;  %v1096_v37 = vadd.f32 %v460_v33, %v1075_v22  ;;  %v421_v39 = vadd.f32 %v420_v32, %v1075_v22 }
  0xe0   : > { %v422_v36 = vpop.f32.mrf.mxu0  ;;  %v462_v38 = vpop.f32.mrf.mxu1  ;;  %v673_v3 = vmul.f32 %v419_v30, %v419_v30 }
  0xe1   : > { %591 = vst [vmem:[%s1091_s15] sm:$0xff] %v939_v34  ;;  %v423_v40 = vadd.f32 %v422_v36, %v1077_v23  ;;  %599 = vst [vmem:[%s1091_s15 + $0x40] sm:$0xff] %v947_v35  ;;  %v1103_v41 = vadd.f32 %v462_v38, %v1077_v23  ;;  %v674_v61 = vmul.f32 %v421_v39, %v421_v39 }
  0xe2   : > { %v426_v42 = vpop.f32.mrf.mxu0  ;;  %v466_v43 = vpop.f32.mrf.mxu1  ;;  %v607_v5 = vadd.f32 %v421_v39, %v417_v29 }
  0xe3   : > { %v940_v44 = vpack.c.bf16 %v423_v40, %v421_v39  ;;  %v948_v46 = vpack.c.bf16 %v1103_v41, %v1096_v37  ;;  %v1108_v47 = vadd.f32 %v466_v43, %v1075_v22  ;;  %v427_v49 = vadd.f32 %v426_v42, %v1075_v22 }
  0xe4   : > { %v428_v45 = vpop.f32.mrf.mxu0  ;;  %v468_v48 = vpop.f32.mrf.mxu1  ;;  %v675_v62 = vmul.f32 %v423_v40, %v423_v40  ;;  %v704_v15 = vadd.f32 %v674_v61, %v672_v2  ;;  %v628_v16 = vadd.f32 %v423_v40, %v419_v30 }
  0xe5   : > { %592 = vst [vmem:[%s1091_s15 + $0x8] sm:$0xff] %v940_v44  ;;  %v429_v50 = vadd.f32 %v428_v45, %v1077_v23  ;;  %v1114_v51 = vadd.f32 %v468_v48, %v1077_v23  ;;  %600 = vst [vmem:[%s1091_s15 + $0x48] sm:$0xff] %v948_v46  ;;  %v676_v6 = vmul.f32 %v427_v49, %v427_v49 }
  0xe6   : > { %v430_v52 = vpop.f32.mrf.mxu0  ;;  %v470_v53 = vpop.f32.mrf.mxu1  ;;  %v725_v19 = vadd.f32 %v675_v62, %v673_v3  ;;  %v608_v25 = vadd.f32 %v607_v5, %v427_v49 }
  0xe7   : > { %v941_v54 = vpack.c.bf16 %v429_v50, %v427_v49  ;;  %v949_v56 = vpack.c.bf16 %v1114_v51, %v1108_v47  ;;  %v1120_v57 = vadd.f32 %v470_v53, %v1075_v22  ;;  %v431_v59 = vadd.f32 %v430_v52, %v1075_v22 }
  0xe8   : > { %v432_v55 = vpop.f32.mrf.mxu0  ;;  %v472_v58 = vpop.f32.mrf.mxu1  ;;  %v677_v11 = vmul.f32 %v429_v50, %v429_v50  ;;  %v705_v32 = vadd.f32 %v704_v15, %v676_v6  ;;  %v629_v33 = vadd.f32 %v628_v16, %v429_v50 }
  0xe9   : > { %593 = vst [vmem:[%s1091_s15 + $0x10] sm:$0xff] %v941_v54  ;;  %v433_v60 = vadd.f32 %v432_v55, %v1077_v23  ;;  %601 = vst [vmem:[%s1091_s15 + $0x50] sm:$0xff] %v949_v56  ;;  %v1127_v0 = vadd.f32 %v472_v58, %v1077_v23  ;;  %v678_v20 = vmul.f32 %v431_v59, %v431_v59 }
  0xea   : > { %v436_v63 = vpop.f32.mrf.mxu0  ;;  %v476_v1 = vpop.f32.mrf.mxu1  ;;  %v726_v38 = vadd.f32 %v725_v19, %v677_v11  ;;  %v609_v39 = vadd.f32 %v608_v25, %v431_v59 }
  0xeb   : > { %v942_v4 = vpack.c.bf16 %v433_v60, %v431_v59  ;;  %v950_v8 = vpack.c.bf16 %v1127_v0, %v1120_v57  ;;  %v1132_v9 = vadd.f32 %v476_v1, %v1075_v22  ;;  %v437_v12 = vadd.f32 %v436_v63, %v1075_v22 }
  0xec   : > { %v438_v7 = vpop.f32.mrf.mxu0  ;;  %v478_v10 = vpop.f32.mrf.mxu1  ;;  %v679_v27 = vmul.f32 %v433_v60, %v433_v60  ;;  %v706_v43 = vadd.f32 %v705_v32, %v678_v20  ;;  %v630_v44 = vadd.f32 %v629_v33, %v433_v60  ;;  %v688_v32 = vmul.f32 %v1081_v26, %v1081_v26 }
  0xed   : > { %594 = vst [vmem:[%s1091_s15 + $0x18] sm:$0xff] %v942_v4  ;;  %v439_v13 = vadd.f32 %v438_v7, %v1077_v23  ;;  %v1138_v14 = vadd.f32 %v478_v10, %v1077_v23  ;;  %602 = vst [vmem:[%s1091_s15 + $0x58] sm:$0xff] %v950_v8  ;;  %v680_v40 = vmul.f32 %v437_v12, %v437_v12 }
  0xee   : > { %v440_v21 = vpop.f32.mrf.mxu0  ;;  %v480_v24 = vpop.f32.mrf.mxu1  ;;  %v727_v50 = vadd.f32 %v726_v38, %v679_v27  ;;  %v610_v52 = vadd.f32 %v609_v39, %v437_v12 }
  0xef   : > { %v943_v28 = vpack.c.bf16 %v439_v13, %v437_v12  ;;  %v441_v29 = vadd.f32 %v440_v21, %v1075_v22  ;;  %v951_v35 = vpack.c.bf16 %v1138_v14, %v1132_v9  ;;  %v1145_v30 = vadd.f32 %v480_v24, %v1075_v22 }
  0xf0   : > { %v442_v34 = vpop.f32.mrf.mxu0  ;;  %v482_v36 = vpop.f32.mrf.mxu1  ;;  %v681_v45 = vmul.f32 %v439_v13, %v439_v13  ;;  %v631_v55 = vadd.f32 %v630_v44, %v439_v13  ;;  %v707_v62 = vadd.f32 %v706_v43, %v680_v40  ;;  %v690_v43 = vmul.f32 %v1096_v37, %v1096_v37 }
  0xf1   : > { %595 = vst [vmem:[%s1091_s15 + $0x20] sm:$0xff] %v943_v28  ;;  %v443_v42 = vadd.f32 %v442_v34, %v1077_v23  ;;  %603 = vst [vmem:[%s1091_s15 + $0x60] sm:$0xff] %v951_v35  ;;  %v1151_v48 = vadd.f32 %v482_v36, %v1077_v23  ;;  %v682_v53 = vmul.f32 %v441_v29, %v441_v29 }
  0xf2   : > { %v446_v46 = vpop.f32.mrf.mxu0  ;;  %v486_v49 = vpop.f32.mrf.mxu1  ;;  %v611_v63 = vadd.f32 %v610_v52, %v441_v29  ;;  %v728_v3 = vadd.f32 %v727_v50, %v681_v45 }
  0xf3   : > { %v944_v54 = vpack.c.bf16 %v443_v42, %v441_v29  ;;  %v447_v56 = vadd.f32 %v446_v46, %v1075_v22  ;;  %v952_v59 = vpack.c.bf16 %v1151_v48, %v1145_v30  ;;  %v1157_v60 = vadd.f32 %v486_v49, %v1075_v22 }
  0xf4   : > { %v448_v58 = vpop.f32.mrf.mxu0  ;;  %v488_v61 = vpop.f32.mrf.mxu1  ;;  %v632_v4 = vadd.f32 %v631_v55, %v443_v42  ;;  %v683_v5 = vmul.f32 %v443_v42, %v443_v42  ;;  %v708_v10 = vadd.f32 %v707_v62, %v682_v53  ;;  %v694_v55 = vmul.f32 %v1120_v57, %v1120_v57 }
  0xf5   : > { %596 = vst [vmem:[%s1091_s15 + $0x28] sm:$0xff] %v944_v54  ;;  %v449_v1 = vadd.f32 %v448_v58, %v1077_v23  ;;  %v1162_v2 = vadd.f32 %v488_v61, %v1077_v23  ;;  %v684_v6 = vmul.f32 %v447_v56, %v447_v56  ;;  %604 = vst [vmem:[%s1091_s15 + $0x68] sm:$0xff] %v952_v59 }
  0xf6   : > { %v450_v7 = vpop.f32.mrf.mxu0  ;;  %v490_v8 = vpop.f32.mrf.mxu1  ;;  %v612_v11 = vadd.f32 %v611_v63, %v447_v56  ;;  %v729_v33 = vadd.f32 %v728_v3, %v683_v5  ;;  %v693_v59 = vmul.f32 %v1114_v51, %v1114_v51  ;;  %v696_v62 = vmul.f32 %v1132_v9, %v1132_v9 }
  0xf7   : > { %v945_v12 = vpack.c.bf16 %v449_v1, %v447_v56  ;;  %v451_v13 = vadd.f32 %v450_v7, %v1075_v22  ;;  %v633_v15 = vadd.f32 %v632_v4, %v449_v1  ;;  %v685_v16 = vmul.f32 %v449_v1, %v449_v1 }
  0xf8   : > { %v452_v19 = vpop.f32.mrf.mxu0  ;;  %v953_v20 = vpack.c.bf16 %v1162_v2, %v1157_v60  ;;  %v491_v21 = vadd.f32 %v490_v8, %v1075_v22  ;;  %v492_v24 = vpop.f32.mrf.mxu1  ;;  %v709_v25 = vadd.f32 %v708_v10, %v684_v6  ;;  %v695_v1 = vmul.f32 %v1127_v0, %v1127_v0 }
  0xf9   : > { %597 = vst [vmem:[%s1091_s15 + $0x30] sm:$0xff] %v945_v12  ;;  %v613_v27 = vadd.f32 %v612_v11, %v451_v13  ;;  %v686_v28 = vmul.f32 %v451_v13, %v451_v13  ;;  %v453_v29 = vadd.f32 %v452_v19, %v1077_v23  ;;  %v493_v34 = vadd.f32 %v492_v24, %v1077_v23 }
  0xfa   : > { %605 = vst [vmem:[%s1091_s15 + $0x70] sm:$0xff] %v953_v20  ;;  %v730_v39 = vadd.f32 %v729_v33, %v685_v16  ;;  %v689_v23 = vmul.f32 %v1086_v31, %v1086_v31  ;;  %v698_v4 = vmul.f32 %v1145_v30, %v1145_v30  ;;  %v697_v6 = vmul.f32 %v1138_v14, %v1138_v14 }
  0xfb   : > { %v614_v35 = vadd.f32 %v613_v27, %v1081_v26  ;;  %v710_v36 = vadd.f32 %v709_v25, %v686_v28  ;;  %v946_v22 = vpack.c.bf16 %v453_v29, %v451_v13  ;;  %v634_v38 = vadd.f32 %v633_v15, %v453_v29 }
  0xfc   : > { %v687_v40 = vmul.f32 %v453_v29, %v453_v29  ;;  %v954_v42 = vpack.c.bf16 %v493_v34, %v491_v21  ;;  %v692_v26 = vmul.f32 %v1108_v47, %v1108_v47  ;;  %v699_v11 = vmul.f32 %v1151_v48, %v1151_v48 }
  0xfd   : > { %v615_v44 = vadd.f32 %v614_v35, %v1096_v37  ;;  %v711_v45 = vadd.f32 %v710_v36, %v688_v32  ;;  %598 = vst [vmem:[%s1091_s15 + $0x38] sm:$0xff] %v946_v22  ;;  %v635_v46 = vadd.f32 %v634_v38, %v1086_v31  ;;  %v691_v37 = vmul.f32 %v1103_v41, %v1103_v41 }
  0xfe   : > { %v731_v49 = vadd.f32 %v730_v39, %v687_v40  ;;  %606 = vst [vmem:[%s1091_s15 + $0x78] sm:$0xff] %v954_v42  ;;  %v702_v16 = vmul.f32 %v491_v21, %v491_v21  ;;  %v703_v28 = vmul.f32 %v493_v34, %v493_v34  ;;  %v996_v22 = vmov 1966171168  }
  0xff   : > { %v712_v50 = vadd.f32 %v711_v45, %v690_v43  ;;  %v636_v52 = vadd.f32 %v635_v46, %v1103_v41  ;;  %v616_v53 = vadd.f32 %v615_v44, %v1108_v47 }
 0x100   : > { %v732_v54 = vadd.f32 %v731_v49, %v689_v23 }
 0x101   : > { %v617_v56 = vadd.f32 %v616_v53, %v1120_v57  ;;  %v713_v31 = vadd.f32 %v712_v50, %v692_v26  ;;  %v637_v58 = vadd.f32 %v636_v52, %v1114_v51 }
 0x102   : > { %v733_v61 = vadd.f32 %v732_v54, %v691_v37 }
 0x103   : > { %v618_v47 = vadd.f32 %v617_v56, %v1132_v9  ;;  %v714_v63 = vadd.f32 %v713_v31, %v694_v55  ;;  %v638_v41 = vadd.f32 %v637_v58, %v1127_v0  ;;  %v700_v0 = vmul.f32 %v1157_v60, %v1157_v60 }
 0x104   : > { %v734_v3 = vadd.f32 %v733_v61, %v693_v59 }
 0x105   : > { %v619_v57 = vadd.f32 %v618_v47, %v1145_v30  ;;  %v715_v5 = vadd.f32 %v714_v63, %v696_v62  ;;  %v639_v51 = vadd.f32 %v638_v41, %v1138_v14  ;;  %v701_v14 = vmul.f32 %v1162_v2, %v1162_v2 }
 0x106   : > { %v735_v7 = vadd.f32 %v734_v3, %v695_v1 }
 0x107   : > { %v716_v9 = vadd.f32 %v715_v5, %v698_v4  ;;  %v640_v8 = vadd.f32 %v639_v51, %v1151_v48  ;;  %v620_v10 = vadd.f32 %v619_v57, %v1157_v60 }
 0x108   : > { %v736_v12 = vadd.f32 %v735_v7, %v697_v6 }
 0x109   : > { %v717_v30 = vadd.f32 %v716_v9, %v700_v0  ;;  %v641_v13 = vadd.f32 %v640_v8, %v1162_v2  ;;  %v621_v15 = vadd.f32 %v620_v10, %v491_v21  ;;  %v653_v21 = vunpack.c.l.s4 %v996_v22 }
 0x10a   : > { %v737_v19 = vadd.f32 %v736_v12, %v699_v11 }
 0x10b   : > { %v622_v20 = vrot.slane %v621_v15, 4  ;;  %v718_v24 = vadd.f32 %v717_v30, %v702_v16  ;;  %v642_v25 = vadd.f32 %v641_v13, %v493_v34  ;;  %v654_v34 = vunpack.c.0.s8 %v653_v21 }
 0x10c   : > { %v738_v27 = vadd.f32 %v737_v19, %v701_v14 }
 0x10d   : > { %v623_v60 = vadd.f32 %v622_v20, %v621_v15  ;;  %v719_v29 = vrot.slane %v718_v24, 4  ;;  %v643_v32 = vrot.slane %v642_v25, 4  ;;  %v657_v53 = vsub.s32 %v654_v34, %v1068_v18 }
 0x10e   : > { %v739_v48 = vadd.f32 %v738_v27, %v703_v28 }
 0x10f   : > { %v624_v33 = vrot.slane %v623_v60, 2  ;;  %v720_v35 = vadd.f32 %v719_v29, %v718_v24  ;;  %v644_v36 = vadd.f32 %v643_v32, %v642_v25 }
 0x110   : > { %v740_v38 = vrot.slane %v739_v48, 4 }
 0x111   : > { %v625_v39 = vadd.f32 %v624_v33, %v623_v60  ;;  %v721_v40 = vrot.slane %v720_v35, 2  ;;  %v645_v2 = vrot.slane %v644_v36, 2 }
 0x112   : > { %v741_v42 = vadd.f32 %v740_v38, %v739_v48 }
 0x113   : > { %v626_v43 = vrot.slane %v625_v39, 1  ;;  %v722_v44 = vadd.f32 %v721_v40, %v720_v35  ;;  %v646_v45 = vadd.f32 %v645_v2, %v644_v36 }
 0x114   : > { %v742_v46 = vrot.slane %v741_v42, 2 }
 0x115   : > { %v647_v23 = vrot.slane %v646_v45, 1  ;;  %v723_v49 = vrot.slane %v722_v44, 1  ;;  %v627_v50 = vadd.f32 %v626_v43, %v625_v39 }
 0x116   : > { %v743_v26 = vadd.f32 %v742_v46, %v741_v42 }
 0x117   : > { %v648_v52 = vadd.f32 %v647_v23, %v646_v45  ;;  %v724_v55 = vadd.f32 %v723_v49, %v722_v44 }
 0x118   : > { %v744_v37 = vrot.slane %v743_v26, 1 }
 0x119   : > { %v651_v54 = vcombine.low %v627_v50, %v648_v52 }
 0x11a   : > { %v745_v56 = vadd.f32 %v744_v37, %v743_v26 }
 0x11b   : > { %v658_v31 = vrot.slane %v651_v54, %v657_v53 }
 0x11c   : > { %v748_v58 = vcombine.low %v724_v55, %v745_v56 }
 0x11d   : > { %v665_v59 = vrot.slane %v658_v31, %v657_v53 }
 0x11e   : > { %v755_v61 = vrot.slane %v748_v58, %v657_v53 }
 0x11f   : > { %671 = vst.msk [vmem:[%s246_s21] sm:$0x3] %vm669_vm2, %v665_v59 }
 0x120   : > { %v762_v18 = vrot.slane %v755_v61, %v657_v53 }
 0x122   : > { %764 = vst.msk [vmem:[%s250_s24] sm:$0x3] %vm669_vm2, %v762_v18 }
 0x123 PF: > { %s16_s18 = sadd.s32 1, %s993_s18  }
 0x124   : > { %p13_p5 = scmp.ge.s32.totalorder %s16_s18, 6  }
 0x126   :  { %15 = sbr.rel (!%p13_p5) target bundleno = 1 (0x1), region = 86 }

// kernel: vit_segmentation_head.3
= control target key start
LH: loop header
LB: loop body
LE: loop exit
PB: predicated region body
PF: predicated region fallthrough
CT: control target
= control target key end

     0   :  { %s1035_s18 = smov 0   ;;  %s1235_s0 = inlined_call_operand.vmem [shape: bf16[512,256], index: 0, kind: input, shape index: {}]   ;;  %s1236_s1 = inlined_call_operand.vmem [shape: f32[1,256], index: 1, kind: input, shape index: {}]   ;;  %s1237_s2 = inlined_call_operand.vmem [shape: f32[1,256], index: 2, kind: input, shape index: {}]   ;;  %s1238_s3 = inlined_call_operand.vmem [shape: bf16[256,128], index: 3, kind: input, shape index: {}]   ;;  %s1239_s4 = inlined_call_operand.vmem [shape: f32[1,128], index: 4, kind: input, shape index: {}]   ;;  %s1240_s5 = inlined_call_operand.vmem [shape: bf16[512,128], index: 5, kind: output, shape index: {}]  }
   0x1 LB: > { %s784_s19 = sadd.s32 4294967295, %s1003_s18   ;;  %p788_p0 = scmp.ge.s32.totalorder %s1003_s18, 1  ;;  %s1003_s18 = sphi %s1035_s18, %s15_s18  }
   0x2   : > { %p189_p1 = scmp.lt.s32.totalorder %s1003_s18, 5 }
   0x4   : > { %p190_p2 = pnand %p788_p0, %p189_p1 }
   0x5   : > { %s789_s22 = sshll.u32 (!%p190_p2), %s784_s19, 4 }
   0x6   : > { %193 = sbr.rel (%p190_p2) target bundleno = 274 (0x112), region = 40  ;;  %p219_p3 = scmp.lt.s32.totalorder (!%p190_p2), %s789_s22, 63 }
   0xb   : > { %v981_v0 = vld [vmem:[%s1238_s3 + $0x78] sm:$0xff]   ;;  %v983_v2 = vld [vmem:[%s1238_s3 + $0x70] sm:$0xff]   ;;  %v985_v4 = vld [vmem:[%s1238_s3 + $0x68] sm:$0xff]   ;;  %v282_v5 = vlaneseq  ;;  %s1242_s22 = smov (!%p219_p3, %s789_s22), 63 }
   0xc   : > { %v982_v1 = vld [vmem:[%s1238_s3 + $0x38] sm:$0xff]   ;;  %893 = vmatprep.subr.bf16.mxu0 %v981_v0  ;;  %957 = vmatprep.subr.bf16.mxu1 %v981_v0  ;;  %v984_v3 = vld [vmem:[%s1238_s3 + $0x30] sm:$0xff]   ;;  %v986_v6 = vld [vmem:[%s1238_s3 + $0x28] sm:$0xff]   ;;  %s829_s10 = sshll.u32 %s1242_s22, 3  ;;  %s793_s15 = sshll.u32 %s1242_s22, 2 }
   0xd   : > { %894 = vmatpush3.bf16.msra.mxu0 %v982_v1  ;;  %965 = vmatpush3.bf16.msra.mxu1 %v982_v1  ;;  %v987_v7 = vld [vmem:[%s1238_s3 + $0x60] sm:$0xff]   ;;  %v283_v8 = vshrl.u32 %v282_v5, 7  ;;  %v989_v10 = vld [vmem:[%s1238_s3 + $0x58] sm:$0xff]   ;;  %s1076_s17 = scalar_lea.vmem %s1235_s0, %s829_s10  ;;  %v991_v14 = vld [vmem:[%s1238_s3 + $0x50] sm:$0xff]   ;;  %s1210_s19 = scalar_lea.vmem %s1240_s5, %s793_s15 }
   0xe   : > { %895 = vmatprep.subr.bf16.mxu0 %v983_v2  ;;  %958 = vmatprep.subr.bf16.mxu1 %v983_v2  ;;  %v988_v9 = vld [vmem:[%s1238_s3 + $0x20] sm:$0xff]   ;;  %v990_v12 = vld [vmem:[%s1238_s3 + $0x18] sm:$0xff]   ;;  %v233_v16 = vld [vmem:[%s1076_s17 + $0x8] sm:$0xff] }
   0xf   : > { %v284_v11 = vsub.s32 0, %v283_v8  ;;  %v288_v13 = vsub.s32 1, %v283_v8  ;;  %v232_v15 = vld [vmem:[%s1076_s17] sm:$0xff]  ;;  %v250_v20 = vunpack.c.l.bf16 %v233_v16  ;;  %v251_v21 = vunpack.c.h.bf16 %v233_v16  ;;  %v241_v24 = vld [vmem:[%s1076_s17 + $0x48] sm:$0xff]  ;;  %v1103_v29 = vld [vmem:[%s1076_s17 + $0x10] sm:$0xff] }
  0x10   : > { %v280_v17 = vld [vmem:[%s1236_s1] sm:$0x3]  ;;  %v248_v18 = vunpack.c.l.bf16 %v232_v15  ;;  %v249_v19 = vunpack.c.h.bf16 %v232_v15  ;;  %v992_v30 = vld [vmem:[%s1238_s3 + $0x10] sm:$0xff]   ;;  %v266_v33 = vunpack.c.l.bf16 %v241_v24  ;;  %v267_v34 = vunpack.c.h.bf16 %v241_v24  ;;  %v993_v35 = vld [vmem:[%s1238_s3 + $0x48] sm:$0xff]  }
  0x11   : > { %896 = vmatpush3.bf16.msra.mxu0 %v984_v3  ;;  %966 = vmatpush3.bf16.msra.mxu1 %v984_v3  ;;  %v324_v22 = vld [vmem:[%s1237_s2] sm:$0x3]  ;;  %v1094_v25 = vrot.slane %v280_v17, %v284_v11  ;;  %v1096_v26 = vrot.slane %v280_v17, %v288_v13  ;;  %v235_v39 = vld [vmem:[%s1076_s17 + $0x18] sm:$0xff]  ;;  %v253_v40 = vunpack.c.h.bf16 %v1103_v29  ;;  %v994_v49 = vld [vmem:[%s1238_s3 + $0x8] sm:$0xff]  }
  0x12   : > { %897 = vmatprep.subr.bf16.mxu0 %v985_v4  ;;  %959 = vmatprep.subr.bf16.mxu1 %v985_v4  ;;  %v240_v23 = vld [vmem:[%s1076_s17 + $0x40] sm:$0xff]  ;;  %v1098_v27 = vrot.slane %v324_v22, %v284_v11  ;;  %v1100_v28 = vrot.slane %v324_v22, %v288_v13  ;;  %v255_v53 = vunpack.c.h.bf16 %v235_v39  ;;  %v242_v59 = vld [vmem:[%s1076_s17 + $0x50] sm:$0xff]  ;;  %v243_v0 = vld [vmem:[%s1076_s17 + $0x58] sm:$0xff]  ;;  %v252_v13 = vunpack.c.l.bf16 %v1103_v29 }
  0x13   : > { %v264_v31 = vunpack.c.l.bf16 %v240_v23  ;;  %v265_v32 = vunpack.c.h.bf16 %v240_v23  ;;  %v293_v36 = vmul.f32 %v1096_v26, %v249_v19  ;;  %v295_v37 = vmul.f32 %v1096_v26, %v251_v21  ;;  %v995_v54 = vld [vmem:[%s1238_s3 + $0x40] sm:$0xff]  }
  0x14   : > { %v292_v38 = vmul.f32 %v1094_v25, %v248_v18  ;;  %v311_v42 = vmul.f32 %v1096_v26, %v267_v34  ;;  %v294_v43 = vmul.f32 %v1094_v25, %v250_v20  ;;  %v310_v48 = vmul.f32 %v1094_v25, %v266_v33  ;;  %v996_v5 = vld [vmem:[%s1238_s3] sm:$0xff]  }
  0x15   : > { %898 = vmatpush3.bf16.msra.mxu0 %v986_v6  ;;  %967 = vmatpush3.bf16.msra.mxu1 %v986_v6  ;;  %v309_v41 = vmul.f32 %v1096_v26, %v265_v32  ;;  %v308_v44 = vmul.f32 %v1094_v25, %v264_v31  ;;  %v337_v45 = vadd.f32 %v1100_v28, %v293_v36  ;;  %v254_v16 = vunpack.c.l.bf16 %v235_v39  ;;  %v236_v18 = vld [vmem:[%s1076_s17 + $0x20] sm:$0xff]  ;;  %v237_v31 = vld [vmem:[%s1076_s17 + $0x28] sm:$0xff] }
  0x16   : > { %899 = vmatprep.subr.bf16.mxu0 %v987_v7  ;;  %960 = vmatprep.subr.bf16.mxu1 %v987_v7  ;;  %v339_v46 = vadd.f32 %v1100_v28, %v295_v37  ;;  %v336_v47 = vadd.f32 %v1098_v27, %v292_v38  ;;  %v355_v51 = vadd.f32 %v1100_v28, %v311_v42  ;;  %v268_v17 = vunpack.c.l.bf16 %v242_v59  ;;  %v244_v36 = vld [vmem:[%s1076_s17 + $0x60] sm:$0xff] }
  0x17   : > { %v353_v50 = vadd.f32 %v1100_v28, %v309_v41  ;;  %v338_v52 = vadd.f32 %v1098_v27, %v294_v43  ;;  %v369_v55 = vmax.f32 %v337_v45, 0.0  ;;  %v352_v58 = vadd.f32 %v1098_v27, %v308_v44  ;;  %v245_v41 = vld [vmem:[%s1076_s17 + $0x68] sm:$0xff] }
  0x18   : > { %v371_v56 = vmax.f32 %v339_v46, 0.0  ;;  %v368_v57 = vmax.f32 %v336_v47, 0.0  ;;  %v387_v61 = vmax.f32 %v355_v51, 0.0  ;;  %v354_v63 = vadd.f32 %v1098_v27, %v310_v48 }
  0x19   : > { %900 = vmatpush3.bf16.msra.mxu0 %v988_v9  ;;  %968 = vmatpush3.bf16.msra.mxu1 %v988_v9  ;;  %v385_v60 = vmax.f32 %v353_v50, 0.0  ;;  %v370_v62 = vmax.f32 %v338_v52, 0.0  ;;  %v384_v2 = vmax.f32 %v352_v58, 0.0  ;;  %v297_v3 = vmul.f32 %v1096_v26, %v253_v40 }
  0x1a   : > { %901 = vmatprep.subr.bf16.mxu0 %v989_v10  ;;  %961 = vmatprep.subr.bf16.mxu1 %v989_v10  ;;  %v401_v1 = vpack.c.bf16 %v371_v56, %v369_v55  ;;  %v299_v4 = vmul.f32 %v1096_v26, %v255_v53  ;;  %v386_v8 = vmax.f32 %v354_v63, 0.0  ;;  %v269_v9 = vunpack.c.h.bf16 %v242_v59 }
  0x1b   : > { %v409_v6 = vpack.c.bf16 %v387_v61, %v385_v60  ;;  %v400_v7 = vpack.c.bf16 %v370_v62, %v368_v57  ;;  %v341_v10 = vadd.f32 %v1100_v28, %v297_v3  ;;  %v296_v22 = vmul.f32 %v1094_v25, %v252_v13  ;;  %v238_v62 = vld [vmem:[%s1076_s17 + $0x30] sm:$0xff] }
  0x1c   : > { %v343_v11 = vadd.f32 %v1100_v28, %v299_v4  ;;  %583 = vmatprep.mubr.bf16.mxu0 %v401_v1  ;;  %v313_v15 = vmul.f32 %v1096_v26, %v269_v9  ;;  %v298_v24 = vmul.f32 %v1094_v25, %v254_v16  ;;  %v270_v29 = vunpack.c.l.bf16 %v243_v0 }
  0x1d   : > { %902 = vmatpush3.bf16.msra.mxu0 %v990_v12  ;;  %969 = vmatpush3.bf16.msra.mxu1 %v990_v12  ;;  %v271_v12 = vunpack.c.h.bf16 %v243_v0  ;;  %v373_v19 = vmax.f32 %v341_v10, 0.0  ;;  %v340_v34 = vadd.f32 %v1098_v27, %v296_v22  ;;  %v259_v44 = vunpack.c.h.bf16 %v237_v31 }
  0x1e   : > { %903 = vmatprep.subr.bf16.mxu0 %v991_v14  ;;  %962 = vmatprep.subr.bf16.mxu1 %v991_v14  ;;  %v408_v14 = vpack.c.bf16 %v386_v8, %v384_v2  ;;  %v375_v20 = vmax.f32 %v343_v11, 0.0  ;;  %v357_v23 = vadd.f32 %v1100_v28, %v313_v15  ;;  %v342_v38 = vadd.f32 %v1098_v27, %v298_v24 }
  0x1f   : > { %615 = vmatprep.mubr.bf16.mxu1 %v409_v6  ;;  %v315_v21 = vmul.f32 %v1096_v26, %v271_v12  ;;  %v314_v39 = vmul.f32 %v1094_v25, %v270_v29  ;;  %v372_v43 = vmax.f32 %v340_v34, 0.0  ;;  %v303_v51 = vmul.f32 %v1096_v26, %v259_v44  ;;  %v246_v12 = vld [vmem:[%s1076_s17 + $0x70] sm:$0xff] }
  0x20   : > { %v403_v32 = vpack.c.bf16 %v375_v20, %v373_v19  ;;  %v389_v37 = vmax.f32 %v357_v23, 0.0  ;;  %v374_v46 = vmax.f32 %v342_v38, 0.0  ;;  %v275_v53 = vunpack.c.h.bf16 %v245_v41 }
  0x21   : > { %904 = vmatpush3.bf16.msra.mxu0 %v992_v30  ;;  %970 = vmatpush3.bf16.msra.mxu1 %v992_v30  ;;  %v312_v30 = vmul.f32 %v1094_v25, %v268_v17  ;;  %v359_v33 = vadd.f32 %v1100_v28, %v315_v21  ;;  %v358_v47 = vadd.f32 %v1098_v27, %v314_v39  ;;  %v256_v57 = vunpack.c.l.bf16 %v236_v18  ;;  %v247_v17 = vld [vmem:[%s1076_s17 + $0x78] sm:$0xff] }
  0x22   : > { %905 = vmatprep.subr.bf16.mxu0 %v993_v35  ;;  %963 = vmatprep.subr.bf16.mxu1 %v993_v35  ;;  %v257_v35 = vunpack.c.h.bf16 %v236_v18  ;;  %v347_v58 = vadd.f32 %v1100_v28, %v303_v51  ;;  %v319_v60 = vmul.f32 %v1096_v26, %v275_v53  ;;  %v258_v61 = vunpack.c.l.bf16 %v237_v31 }
  0x23   : > { %v356_v40 = vadd.f32 %v1098_v27, %v312_v30  ;;  %v391_v42 = vmax.f32 %v359_v33, 0.0  ;;  %v390_v55 = vmax.f32 %v358_v47, 0.0  ;;  %v300_v1 = vmul.f32 %v1094_v25, %v256_v57 }
  0x24   : > { %v301_v45 = vmul.f32 %v1096_v26, %v257_v35  ;;  %v272_v2 = vunpack.c.l.bf16 %v244_v36  ;;  %v379_v3 = vmax.f32 %v347_v58, 0.0  ;;  %v363_v4 = vadd.f32 %v1100_v28, %v319_v60 }
  0x25   : > { %906 = vmatpush3.bf16.msra.mxu0 %v994_v49  ;;  %971 = vmatpush3.bf16.msra.mxu1 %v994_v49  ;;  %v388_v48 = vmax.f32 %v356_v40, 0.0  ;;  %v273_v49 = vunpack.c.h.bf16 %v244_v36  ;;  %v411_v50 = vpack.c.bf16 %v391_v42, %v389_v37  ;;  %v274_v6 = vunpack.c.l.bf16 %v245_v41 }
  0x26   : > { %907 = vmatprep.subr.bf16.mxu0 %v995_v54  ;;  %964 = vmatprep.subr.bf16.mxu1 %v995_v54  ;;  %v345_v52 = vadd.f32 %v1100_v28, %v301_v45  ;;  %v402_v54 = vpack.c.bf16 %v374_v46, %v372_v43  ;;  %v344_v9 = vadd.f32 %v1098_v27, %v300_v1  ;;  %v261_v11 = vunpack.c.h.bf16 %v238_v62 }
  0x27   : > { %v317_v56 = vmul.f32 %v1096_v26, %v273_v49  ;;  %v410_v63 = vpack.c.bf16 %v390_v55, %v388_v48  ;;  %v316_v10 = vmul.f32 %v1094_v25, %v272_v2  ;;  %v318_v16 = vmul.f32 %v1094_v25, %v274_v6 }
  0x28   : > { %v377_v59 = vmax.f32 %v345_v52, 0.0  ;;  %v376_v18 = vmax.f32 %v344_v9, 0.0  ;;  %v305_v21 = vmul.f32 %v1096_v26, %v261_v11  ;;  %v277_v29 = vunpack.c.h.bf16 %v246_v12 }
  0x29   : > { %908 = vmatpush3.bf16.msra.mxu0 %v996_v5  ;;  %972 = vmatpush3.bf16.msra.mxu1 %v996_v5  ;;  %v361_v0 = vadd.f32 %v1100_v28, %v317_v56  ;;  %v302_v5 = vmul.f32 %v1094_v25, %v258_v61  ;;  %v360_v19 = vadd.f32 %v1098_v27, %v316_v10  ;;  %v279_v33 = vunpack.c.h.bf16 %v247_v17 }
  0x2a   : > { %v405_v13 = vpack.c.bf16 %v379_v3, %v377_v59  ;;  %v362_v24 = vadd.f32 %v1098_v27, %v318_v16  ;;  %v321_v36 = vmul.f32 %v1096_v26, %v277_v29  ;;  %v260_v37 = vunpack.c.l.bf16 %v238_v62 }
  0x2b   : > { %v393_v8 = vmax.f32 %v361_v0, 0.0  ;;  %v346_v15 = vadd.f32 %v1098_v27, %v302_v5  ;;  %v392_v30 = vmax.f32 %v360_v19, 0.0  ;;  %v323_v40 = vmul.f32 %v1096_v26, %v279_v33 }
  0x2c   : > { %584 = vmatmul.mubr.bf16.vlgmr.msra.gmra.mxu0 %v400_v7  ;;  %616 = vmatmul.mubr.bf16.vlgmr.msra.gmra.mxu1 %v408_v14  ;;  %v239_v7 = vld [vmem:[%s1076_s17 + $0x38] sm:$0xff]  ;;  %v395_v14 = vmax.f32 %v363_v4, 0.0  ;;  %v394_v35 = vmax.f32 %v362_v24, 0.0  ;;  %v365_v43 = vadd.f32 %v1100_v28, %v321_v36  ;;  %v304_v44 = vmul.f32 %v1094_v25, %v260_v37 }
  0x2d   : > { %591 = vmatprep.mubr.bf16.mxu0 %v403_v32  ;;  %623 = vmatprep.mubr.bf16.mxu1 %v411_v50  ;;  %v263_v20 = vunpack.c.h.bf16 %v239_v7  ;;  %v378_v23 = vmax.f32 %v346_v15, 0.0  ;;  %v349_v32 = vadd.f32 %v1100_v28, %v305_v21  ;;  %v262_v41 = vunpack.c.l.bf16 %v239_v7 }
  0x2e   : > { %v413_v22 = vpack.c.bf16 %v395_v14, %v393_v8  ;;  %v412_v42 = vpack.c.bf16 %v394_v35, %v392_v30  ;;  %v276_v45 = vunpack.c.l.bf16 %v246_v12  ;;  %v367_v47 = vadd.f32 %v1100_v28, %v323_v40 }
  0x2f   : > { %v307_v31 = vmul.f32 %v1096_v26, %v263_v20  ;;  %v404_v34 = vpack.c.bf16 %v378_v23, %v376_v18  ;;  %v381_v39 = vmax.f32 %v349_v32, 0.0  ;;  %v306_v48 = vmul.f32 %v1094_v25, %v262_v41 }
  0x30   : > { %v278_v49 = vunpack.c.l.bf16 %v247_v17  ;;  %v397_v50 = vmax.f32 %v365_v43, 0.0  ;;  %v348_v51 = vadd.f32 %v1098_v27, %v304_v44  ;;  %v320_v26 = vmul.f32 %v1094_v25, %v276_v45 }
  0x31   : > { %v351_v38 = vadd.f32 %v1100_v28, %v307_v31  ;;  %v399_v53 = vmax.f32 %v367_v47, 0.0 }
  0x32   : > { %v322_v55 = vmul.f32 %v1094_v25, %v278_v49  ;;  %v380_v56 = vmax.f32 %v348_v51, 0.0  ;;  %v364_v57 = vadd.f32 %v1098_v27, %v320_v26 }
  0x33   : > { %v383_v46 = vmax.f32 %v351_v38, 0.0  ;;  %v415_v28 = vpack.c.bf16 %v399_v53, %v397_v50 }
  0x34   : > { %592 = vmatmul.mubr.bf16.gmra.mxu0 %v402_v54  ;;  %624 = vmatmul.mubr.bf16.gmra.mxu1 %v410_v63  ;;  %v350_v54 = vadd.f32 %v1098_v27, %v306_v48  ;;  %v366_v59 = vadd.f32 %v1098_v27, %v322_v55  ;;  %v396_v60 = vmax.f32 %v364_v57, 0.0  ;;  %v1200_v27 = vld [vmem:[%s1239_s4] ss:$0 sm:$0xff] }
  0x35   : > { %599 = vmatprep.mubr.bf16.mxu0 %v405_v13  ;;  %631 = vmatprep.mubr.bf16.mxu1 %v413_v22  ;;  %v407_v52 = vpack.c.bf16 %v383_v46, %v381_v39 }
  0x36   : > { %v382_v58 = vmax.f32 %v350_v54, 0.0  ;;  %v398_v62 = vmax.f32 %v366_v59, 0.0 }
  0x38   : > { %v406_v61 = vpack.c.bf16 %v382_v58, %v380_v56  ;;  %v414_v63 = vpack.c.bf16 %v398_v62, %v396_v60 }
  0x3c   : > { %600 = vmatmul.mubr.bf16.gmra.mxu0 %v404_v34  ;;  %632 = vmatmul.mubr.bf16.gmra.mxu1 %v412_v42 }
  0x3d   : > { %607 = vmatprep.mubr.bf16.mxu0 %v407_v52  ;;  %639 = vmatprep.mubr.bf16.mxu1 %v415_v28 }
  0x44   : > { %608 = vmatmul.mubr.bf16.gmra.mxu0 %v406_v61  ;;  %640 = vmatmul.mubr.bf16.gmra.mxu1 %v414_v63 }
  0xec   : > { %v909_v0 = vpop.f32.mrf.mxu0  ;;  %v933_v1 = vpop.f32.mrf.mxu1 }
  0xee   : > { %v910_v2 = vpop.f32.mrf.mxu0  ;;  %v934_v25 = vpop.f32.mrf.mxu1 }
  0xef   : > { %v911_v5 = vadd.f32 %v910_v2, %v909_v0  ;;  %v935_v6 = vadd.f32 %v934_v25, %v933_v1 }
  0xf0   : > { %v912_v3 = vpop.f32.mrf.mxu0  ;;  %v936_v4 = vpop.f32.mrf.mxu1 }
  0xf1   : > { %v586_v13 = vadd.f32 %v911_v5, %v1200_v27  ;;  %v618_v14 = vadd.f32 %v935_v6, %v1200_v27 }
  0xf2   : > { %v913_v7 = vpop.f32.mrf.mxu0  ;;  %v937_v8 = vpop.f32.mrf.mxu1 }
  0xf3   : > { %v914_v9 = vadd.f32 %v913_v7, %v912_v3  ;;  %v938_v10 = vadd.f32 %v937_v8, %v936_v4 }
  0xf4   : > { %v915_v11 = vpop.f32.mrf.mxu0  ;;  %v939_v12 = vpop.f32.mrf.mxu1 }
  0xf5   : > { %v589_v15 = vadd.f32 %v914_v9, %v1200_v27  ;;  %v621_v16 = vadd.f32 %v938_v10, %v1200_v27 }
  0xf6   : > { %v916_v17 = vpop.f32.mrf.mxu0  ;;  %v940_v18 = vpop.f32.mrf.mxu1 }
  0xf7   : > { %v849_v19 = vpack.c.bf16 %v589_v15, %v586_v13  ;;  %v869_v20 = vpack.c.bf16 %v621_v16, %v618_v14  ;;  %v917_v23 = vadd.f32 %v916_v17, %v915_v11  ;;  %v941_v24 = vadd.f32 %v940_v18, %v939_v12 }
  0xf8   : > { %v918_v21 = vpop.f32.mrf.mxu0  ;;  %v942_v22 = vpop.f32.mrf.mxu1 }
  0xf9   : > { %850 = vst [vmem:[%s1210_s19] sm:$0xff] %v849_v19   ;;  %889 = vst [vmem:[%s1210_s19 + $0x20] sm:$0xff] %v869_v20   ;;  %v594_v35 = vadd.f32 %v917_v23, %v1200_v27  ;;  %v626_v36 = vadd.f32 %v941_v24, %v1200_v27 }
  0xfa   : > { %v919_v29 = vpop.f32.mrf.mxu0  ;;  %v943_v30 = vpop.f32.mrf.mxu1 }
  0xfb   : > { %v920_v31 = vadd.f32 %v919_v29, %v918_v21  ;;  %v944_v32 = vadd.f32 %v943_v30, %v942_v22 }
  0xfc   : > { %v921_v33 = vpop.f32.mrf.mxu0  ;;  %v945_v34 = vpop.f32.mrf.mxu1 }
  0xfd   : > { %v597_v37 = vadd.f32 %v920_v31, %v1200_v27  ;;  %v629_v38 = vadd.f32 %v944_v32, %v1200_v27 }
  0xfe   : > { %v922_v39 = vpop.f32.mrf.mxu0  ;;  %v946_v40 = vpop.f32.mrf.mxu1 }
  0xff   : > { %v854_v41 = vpack.c.bf16 %v597_v37, %v594_v35  ;;  %v874_v42 = vpack.c.bf16 %v629_v38, %v626_v36  ;;  %v923_v45 = vadd.f32 %v922_v39, %v921_v33  ;;  %v947_v46 = vadd.f32 %v946_v40, %v945_v34 }
 0x100   : > { %v924_v43 = vpop.f32.mrf.mxu0  ;;  %v948_v44 = vpop.f32.mrf.mxu1 }
 0x101   : > { %886 = vst [vmem:[%s1210_s19 + $0x8] sm:$0xff] %v854_v41   ;;  %890 = vst [vmem:[%s1210_s19 + $0x28] sm:$0xff] %v874_v42   ;;  %v602_v26 = vadd.f32 %v923_v45, %v1200_v27  ;;  %v634_v52 = vadd.f32 %v947_v46, %v1200_v27 }
 0x102   : > { %v925_v47 = vpop.f32.mrf.mxu0  ;;  %v949_v48 = vpop.f32.mrf.mxu1 }
 0x103   : > { %v926_v49 = vadd.f32 %v925_v47, %v924_v43  ;;  %v950_v50 = vadd.f32 %v949_v48, %v948_v44 }
 0x104   : > { %v927_v51 = vpop.f32.mrf.mxu0  ;;  %v951_v55 = vpop.f32.mrf.mxu1 }
 0x105   : > { %v605_v53 = vadd.f32 %v926_v49, %v1200_v27  ;;  %v637_v54 = vadd.f32 %v950_v50, %v1200_v27 }
 0x106   : > { %v928_v56 = vpop.f32.mrf.mxu0  ;;  %v952_v58 = vpop.f32.mrf.mxu1 }
 0x107   : > { %v859_v57 = vpack.c.bf16 %v605_v53, %v602_v26  ;;  %v879_v28 = vpack.c.bf16 %v637_v54, %v634_v52  ;;  %v929_v60 = vadd.f32 %v928_v56, %v927_v51  ;;  %v953_v62 = vadd.f32 %v952_v58, %v951_v55 }
 0x108   : > { %v930_v59 = vpop.f32.mrf.mxu0  ;;  %v954_v61 = vpop.f32.mrf.mxu1 }
 0x109   : > { %887 = vst [vmem:[%s1210_s19 + $0x10] sm:$0xff] %v859_v57   ;;  %891 = vst [vmem:[%s1210_s19 + $0x30] sm:$0xff] %v879_v28   ;;  %v610_v25 = vadd.f32 %v929_v60, %v1200_v27  ;;  %v642_v4 = vadd.f32 %v953_v62, %v1200_v27 }
 0x10a   : > { %v931_v63 = vpop.f32.mrf.mxu0  ;;  %v955_v1 = vpop.f32.mrf.mxu1 }
 0x10b   : > { %v932_v0 = vadd.f32 %v931_v63, %v930_v59  ;;  %v956_v2 = vadd.f32 %v955_v1, %v954_v61 }
 0x10d   : > { %v613_v3 = vadd.f32 %v932_v0, %v1200_v27  ;;  %v645_v5 = vadd.f32 %v956_v2, %v1200_v27 }
 0x10f   : > { %v864_v6 = vpack.c.bf16 %v613_v3, %v610_v25  ;;  %v884_v7 = vpack.c.bf16 %v645_v5, %v642_v4 }
 0x111   : > { %888 = vst [vmem:[%s1210_s19 + $0x18] sm:$0xff] %v864_v6   ;;  %892 = vst [vmem:[%s1210_s19 + $0x38] sm:$0xff] %v884_v7  }
 0x112 PF: > { %s15_s18 = sadd.s32 1, %s1003_s18  }
 0x113   : > { %p12_p4 = scmp.ge.s32.totalorder %s15_s18, 6  }
 0x115   :  { %14 = sbr.rel (!%p12_p4) target bundleno = 1 (0x1), region = 70 }

</bundles_post_ra>
